<compile_context>
chip_gen: v7x
topology: tpu7x:2x2x1
jax: 0.10.0
libtpu: 0.0.40
codegen_flags: <defaults>
</compile_context>

<pallas_src>
import functools

import jax
import jax.numpy as jnp
from jax.experimental import pallas as pl
from jax.experimental.pallas import tpu as pltpu

LANES = 128
MAX_BLOCK_ROWS = 4096  # batch tile cap; ~4 MiB double-buffered output, VMEM-safe on v7x


def _round_up(n, m):
    return ((n + m - 1) // m) * m


def build_layout(img_channels, latent_size):
    """Row offsets of each packed section inside the [rows, 128] param slab."""
    sections = [
        ("w1", img_channels), ("b1", 1),
        ("w2", 16), ("b2", 1),
        ("w3", 16), ("b3", 1),
        ("wh", 8), ("bh", 1),          # fused mu|logsigma head
    ]
    offs, row = {}, 0
    for name, rows in sections:
        offs[name] = row
        row += _round_up(rows, 8)      # keep every section 8-row aligned
    return offs, _round_up(row, 8)


def pack_params(p, offs, total_rows):
    """Pack all weights/biases (f32) into a single zero-padded [rows, 128] buffer."""
    wh = jnp.concatenate([p["wmu"], p["wls"]], axis=1)   # [8, 2*latent]
    bh = jnp.concatenate([p["bmu"], p["bls"]], axis=1)   # [1, 2*latent]
    entries = dict(w1=p["w1"], b1=p["b1"], w2=p["w2"], b2=p["b2"],
                   w3=p["w3"], b3=p["b3"], wh=wh, bh=bh)
    buf = jnp.zeros((total_rows, LANES), jnp.float32)
    for name, a in entries.items():
        r, c = a.shape
        buf = buf.at[offs[name]:offs[name] + r, :c].set(a.astype(jnp.float32))
    return buf


def make_encoder_kernel(img_channels, offs):
    C = img_channels

    def kernel(x_ref, p_ref, out_ref):
        x = x_ref[...]                                               # [TB, C]

        # fc1 + relu
        w1 = p_ref[offs["w1"]:offs["w1"] + C, :16]
        b1 = p_ref[offs["b1"]:offs["b1"] + 1, :16]
        h = jnp.maximum(jnp.dot(x, w1, preferred_element_type=jnp.float32) + b1, 0.0)

        # fc2 + relu
        w2 = p_ref[offs["w2"]:offs["w2"] + 16, :16]
        b2 = p_ref[offs["b2"]:offs["b2"] + 1, :16]
        h = jnp.maximum(jnp.dot(h, w2, preferred_element_type=jnp.float32) + b2, 0.0)

        # fc3 + relu
        w3 = p_ref[offs["w3"]:offs["w3"] + 16, :8]
        b3 = p_ref[offs["b3"]:offs["b3"] + 1, :8]
        h = jnp.maximum(jnp.dot(h, w3, preferred_element_type=jnp.float32) + b3, 0.0)

        # Fused mu|logsigma head. Weight/bias are zero-padded to 128 lanes, so
        # one full-width dot gives a lane-dense [TB, 128] slab -> unmasked store.
        wh = p_ref[offs["wh"]:offs["wh"] + 8, :]
        bh = p_ref[offs["bh"]:offs["bh"] + 1, :]
        out_ref[...] = (jnp.dot(h, wh, preferred_element_type=jnp.float32)
                        + bh).astype(out_ref.dtype)

    return kernel


def encoder_forward(x, packed_params, *, img_channels, latent_size, offs, total_rows):
    """x: [B, img_channels] f32 -> (mu, logsigma), each [B, latent_size]."""
    B = x.shape[0]
    TB = min(_round_up(B, 8), MAX_BLOCK_ROWS)
    B_pad = _round_up(B, TB)
    x = x.astype(jnp.float32)
    if B_pad != B:
        x = jnp.pad(x, ((0, B_pad - B), (0, 0)))

    kernel = make_encoder_kernel(img_channels, offs)

    out = pl.pallas_call(
        kernel,
        out_shape=jax.ShapeDtypeStruct((B_pad, LANES), jnp.float32),
        grid=(B_pad // TB,),
        in_specs=[
            pl.BlockSpec((TB, img_channels), lambda i: (i, 0)),   # batch-tiled x
            pl.BlockSpec((total_rows, LANES), lambda i: (0, 0)),  # resident params
        ],
        out_specs=pl.BlockSpec((TB, LANES), lambda i: (i, 0)),
        compiler_params=pltpu.CompilerParams(
            dimension_semantics=("parallel",)),
    )(x, packed_params)

    mu = out[:B, :latent_size]
    logsigma = out[:B, latent_size:2 * latent_size]
    return mu, logsigma


def init_params(key, img_channels, latent_size):
    """Deterministic init (uniform +-1/sqrt(fan_in), like PyTorch Linear default)."""
    def linear(k, fan_in, fan_out):
        kw, kb = jax.random.split(k)
        bound = 1.0 / jnp.sqrt(fan_in)
        w = jax.random.uniform(kw, (fan_in, fan_out), jnp.float32, -bound, bound)
        b = jax.random.uniform(kb, (1, fan_out), jnp.float32, -bound, bound)
        return w, b

    k1, k2, k3, k4, k5 = jax.random.split(key, 5)
    w1, b1 = linear(k1, img_channels, 16)
    w2, b2 = linear(k2, 16, 16)
    w3, b3 = linear(k3, 16, 8)
    wmu, bmu = linear(k4, 8, latent_size)
    wls, bls = linear(k5, 8, latent_size)
    return dict(w1=w1, b1=b1, w2=w2, b2=b2, w3=w3, b3=b3,
                wmu=wmu, bmu=bmu, wls=wls, bls=bls)


def encoder_ref(x, p):
    h = jax.nn.relu(x @ p["w1"] + p["b1"])
    h = jax.nn.relu(h @ p["w2"] + p["b2"])
    h = jax.nn.relu(h @ p["w3"] + p["b3"])
    return h @ p["wmu"] + p["bmu"], h @ p["wls"] + p["bls"]


if __name__ == "__main__":
    img_channels = 4
    latent_size = 8
    batch = 8

    key = jax.random.PRNGKey(0)
    kx, kp = jax.random.split(key)
    x = jax.random.normal(kx, (batch, img_channels), dtype=jnp.float32)
    params = init_params(kp, img_channels, latent_size)

    offs, total_rows = build_layout(img_channels, latent_size)
    packed = pack_params(params, offs, total_rows)

    mu, logsigma = encoder_forward(
        x, packed,
        img_channels=img_channels, latent_size=latent_size,
        offs=offs, total_rows=total_rows)
    jax.block_until_ready((mu, logsigma))

    mu_ref, ls_ref = encoder_ref(x, params)
    assert jnp.allclose(mu, mu_ref, atol=1e-5), "mu mismatch"
    assert jnp.allclose(logsigma, ls_ref, atol=1e-5), "logsigma mismatch"

    print("KERNEL_OK")
</pallas_src>

<mosaic_0001>
module attributes {stable_mosaic.version = 11 : i64} {
  func.func @kernel(%arg0: i32, %arg1: memref<8x4xf32, #tpu.memory_space<vmem>>, %arg2: memref<80x128xf32, #tpu.memory_space<vmem>>, %arg3: memref<8x128xf32, #tpu.memory_space<vmem>>) attributes {dimension_semantics = [#tpu.dimension_semantics<parallel>], iteration_bounds = array<i64: 1>, scalar_prefetch = 0 : i64, scratch_operands = 0 : i64, tpu.core_type = #tpu.core_type<tc>, window_params = [{transform_indices = @transform_0, window_bounds = array<i64: 8, 4>}, {pipeline_mode = #tpu.pipeline_mode<synchronous>, transform_indices = @transform_1, window_bounds = array<i64: 80, 128>}, {transform_indices = @transform_2, window_bounds = array<i64: 8, 128>}]} {
    %c0 = arith.constant 0 : index
    %c0_0 = arith.constant 0 : index
    %0 = vector.load %arg1[%c0, %c0_0] : memref<8x4xf32, #tpu.memory_space<vmem>>, vector<8x4xf32>
    %c0_1 = arith.constant 0 : index
    %c0_2 = arith.constant 0 : index
    %1 = vector.load %arg2[%c0_1, %c0_2] : memref<80x128xf32, #tpu.memory_space<vmem>>, vector<4x16xf32>
    %c8 = arith.constant 8 : index
    %c0_3 = arith.constant 0 : index
    %2 = vector.load %arg2[%c8, %c0_3] : memref<80x128xf32, #tpu.memory_space<vmem>>, vector<1x16xf32>
    %cst = arith.constant dense<0.000000e+00> : vector<8x16xf32>
    %3 = tpu.matmul %0, %1, %cst {dimension_numbers = #tpu.dot_dimension_numbers<[1], [0], [0], [1], [0, 0, 1, 1], [], []>} : vector<8x4xf32>, vector<4x16xf32>, vector<8x16xf32> -> vector<8x16xf32>
    %4 = vector.broadcast %2 : vector<1x16xf32> to vector<8x16xf32>
    %5 = arith.addf %3, %4 : vector<8x16xf32>
    %cst_4 = arith.constant 0.000000e+00 : f32
    %6 = vector.broadcast %cst_4 : f32 to vector<8x16xf32>
    %7 = arith.maximumf %5, %6 : vector<8x16xf32>
    %c16 = arith.constant 16 : index
    %c0_5 = arith.constant 0 : index
    %8 = vector.load %arg2[%c16, %c0_5] : memref<80x128xf32, #tpu.memory_space<vmem>>, vector<16x16xf32>
    %c32 = arith.constant 32 : index
    %c0_6 = arith.constant 0 : index
    %9 = vector.load %arg2[%c32, %c0_6] : memref<80x128xf32, #tpu.memory_space<vmem>>, vector<1x16xf32>
    %cst_7 = arith.constant dense<0.000000e+00> : vector<8x16xf32>
    %10 = tpu.matmul %7, %8, %cst_7 {dimension_numbers = #tpu.dot_dimension_numbers<[1], [0], [0], [1], [0, 0, 1, 1], [], []>} : vector<8x16xf32>, vector<16x16xf32>, vector<8x16xf32> -> vector<8x16xf32>
    %11 = vector.broadcast %9 : vector<1x16xf32> to vector<8x16xf32>
    %12 = arith.addf %10, %11 : vector<8x16xf32>
    %cst_8 = arith.constant 0.000000e+00 : f32
    %13 = vector.broadcast %cst_8 : f32 to vector<8x16xf32>
    %14 = arith.maximumf %12, %13 : vector<8x16xf32>
    %c40 = arith.constant 40 : index
    %c0_9 = arith.constant 0 : index
    %15 = vector.load %arg2[%c40, %c0_9] : memref<80x128xf32, #tpu.memory_space<vmem>>, vector<16x8xf32>
    %c56 = arith.constant 56 : index
    %c0_10 = arith.constant 0 : index
    %16 = vector.load %arg2[%c56, %c0_10] : memref<80x128xf32, #tpu.memory_space<vmem>>, vector<1x8xf32>
    %cst_11 = arith.constant dense<0.000000e+00> : vector<8x8xf32>
    %17 = tpu.matmul %14, %15, %cst_11 {dimension_numbers = #tpu.dot_dimension_numbers<[1], [0], [0], [1], [0, 0, 1, 1], [], []>} : vector<8x16xf32>, vector<16x8xf32>, vector<8x8xf32> -> vector<8x8xf32>
    %18 = vector.broadcast %16 : vector<1x8xf32> to vector<8x8xf32>
    %19 = arith.addf %17, %18 : vector<8x8xf32>
    %cst_12 = arith.constant 0.000000e+00 : f32
    %20 = vector.broadcast %cst_12 : f32 to vector<8x8xf32>
    %21 = arith.maximumf %19, %20 : vector<8x8xf32>
    %c64 = arith.constant 64 : index
    %c0_13 = arith.constant 0 : index
    %22 = vector.load %arg2[%c64, %c0_13] : memref<80x128xf32, #tpu.memory_space<vmem>>, vector<8x128xf32>
    %c72 = arith.constant 72 : index
    %c0_14 = arith.constant 0 : index
    %23 = vector.load %arg2[%c72, %c0_14] : memref<80x128xf32, #tpu.memory_space<vmem>>, vector<1x128xf32>
    %cst_15 = arith.constant dense<0.000000e+00> : vector<8x128xf32>
    %24 = tpu.matmul %21, %22, %cst_15 {dimension_numbers = #tpu.dot_dimension_numbers<[1], [0], [0], [1], [0, 0, 1, 1], [], []>} : vector<8x8xf32>, vector<8x128xf32>, vector<8x128xf32> -> vector<8x128xf32>
    %25 = vector.broadcast %23 : vector<1x128xf32> to vector<8x128xf32>
    %26 = arith.addf %24, %25 : vector<8x128xf32>
    %c0_16 = arith.constant 0 : index
    %c0_17 = arith.constant 0 : index
    %27 = vector.load %arg3[%c0_16, %c0_17] : memref<8x128xf32, #tpu.memory_space<vmem>>, vector<8x128xf32>
    tpu.vector_store %arg3[%c0_16, %c0_17], %26 {strides = array<i32>} : memref<8x128xf32, #tpu.memory_space<vmem>>, vector<8x128xf32>,
    return
  }
  func.func @transform_0(%arg0: i32) -> (i32, i32) {
    %c0_i32 = arith.constant 0 : i32
    %c0_i32_0 = arith.constant 0 : i32
    return %arg0, %c0_i32 : i32, i32
  }
  func.func @transform_1(%arg0: i32) -> (i32, i32) {
    %c0_i32 = arith.constant 0 : i32
    %c0_i32_0 = arith.constant 0 : i32
    %c0_i32_1 = arith.constant 0 : i32
    return %c0_i32, %c0_i32_0 : i32, i32
  }
  func.func @transform_2(%arg0: i32) -> (i32, i32) {
    %c0_i32 = arith.constant 0 : i32
    %c0_i32_0 = arith.constant 0 : i32
    return %arg0, %c0_i32 : i32, i32
  }
}

</mosaic_0001>

<bundles_post_ra>
// kernel: tpu_custom_call.1
= control target key start
LH: loop header
LB: loop body
LE: loop exit
PB: predicated region body
PF: predicated region fallthrough
CT: control target
= control target key end

     0   :  { %7 = vsyncpa [#allocation3], 0  ;;  %s528_s0 = inlined_call_operand.vmem [shape: f32[8,4], index: 0, kind: input, shape index: {}]   ;;  %s529_s1 = inlined_call_operand.hbm [shape: f32[80,128], index: 1, kind: input, shape index: {}]   ;;  %s530_s2 = inlined_call_operand.hbm [shape: f32[8,128], index: 2, kind: output, shape index: {}]  }
   0x1   :  { %8 = vsyncpa [#allocation4], 0  ;;  %s475_s9 = smov [#allocation2]   ;;  %s427_s13 = scalar_lea.hbm %s529_s1, 1280 }
   0x2   :  { %s16_s10 = sshll.u32 %s475_s9, 4  ;;  %p428_p0 = scmp.ne.s32.totalorder %s529_s1, %s427_s13  ;;  %s17_s10 = int_to_ptr.vmem [resolvable:$true] %s16_s10 }
   0x3   :  { %p431_p1 = scmp.lt.u32.totalorder %s427_s13, %s529_s1 }
   0x5   :  { %p433_p2 = pnand %p431_p1, %p428_p0 }
   0x7   :  { %436 = shalt.err (!%p433_p2)
}
   0x8   :  { %s437_s18 = scalar_lea.vmem %s17_s10, 1280  ;;  %p442_p4 = scmp.lt.s32.totalorder %s17_s10, %s17_s10 }
   0x9   :  { %p438_p3 = scmp.ne.s32.totalorder %s17_s10, %s437_s18  ;;  %p443_p5 = scmp.lt.s32.totalorder %s437_s18, %s437_s18 }
   0xb   :  { %p444_p6 = por %p443_p5, %p442_p4 }
   0xd   :  { %p445_p7 = pnand %p444_p6, %p438_p3 }
   0xf   :  { %448 = shalt.err (!%p445_p7)
}
  0x10   :  { %s476_s19 = smov 128   ;;  %s477_s20 = smov 8  }
  0x11   :  { %22 = dma.hbm_to_vmem [thread:$0]  %s529_s1, 1280, %s17_s10, [#allocation3], %s476_s19, %s476_s19, %s477_s20  }
  0x12   :  { %471 = dma.done.wait [#allocation3], 1280  }
  0x13   :  { %472 = vsyncadd [#allocation3], 4294966016  ;;  %v478_v0 = vmov 0.0   ;;  %vm479_vm0 = vmmov 0   ;;  %vm37_vm1 = vcmask 1043456   ;;  %vm33_vm2 = vcmask 31744  }
  0x14   :  { %390 = vmatprep.subr.mxu0 %v478_v0  ;;  %392 = vmatprep.mubr.msk.f32.mxu0 %vm479_vm0, %v478_v0  ;;  %v27_v1 = vld [vmem:[#allocation2] sm:$0xf]  ;;  %v112_v3 = vld [vmem:[#allocation2 + $0x10] sm:$0xff]  ;;  %v113_v4 = vld [vmem:[#allocation2 + $0x18] sm:$0xff]  ;;  %v480_v6 = vmov 0.0|0.0   ;;  %vm119_vm3 = vcmask 130048  }
  0x15   :  { %399 = vmatprep.mubr.msk.f32.mxu1 %vm479_vm0, %v478_v0  ;;  %v26_v2 = vld [vmem:[%s528_s0] sm:$0xff]  ;;  %391 = vmatpush3.msk.msra.mxu0 %vm37_vm1, %v27_v1  ;;  %v415_v5 = vpack.c.bf16 %v113_v4, %v112_v3  ;;  %v371_v7 = vld [vmem:[#allocation2 + $0x8] ss:$0 sm:$0xff]  ;;  %v195_v13 = vld [vmem:[#allocation2 + $0x30] sm:$0xff]  ;;  %vm281_vm4 = vcmask 64512   ;;  %s481_s0 = smov [#allocation5]  }
  0x16   :  { %393 = vmatmul.mubr.msk.f32.vlgmr.msra.gmra.mrb[0].mxu0 %vm33_vm2, %v26_v2  ;;  %414 = vmatprep.subr.bf16.mxu1 %v480_v6  ;;  %v194_v12 = vld [vmem:[#allocation2 + $0x28] sm:$0xff]  ;;  %v374_v15 = vld [vmem:[#allocation2 + $0x20] ss:$0 sm:$0xff]  ;;  %v376_v21 = vld [vmem:[#allocation2 + $0x38] ss:$0 sm:$0xff]  ;;  %s362_s1 = sshll.u32 %s481_s0, 4  ;;  %s363_s1 = int_to_ptr.vmem [resolvable:$true] %s362_s1 }
  0x17   :  { %406 = vmatprep.mubr.msk.f32.mxu0 %vm479_vm0, %v478_v0  ;;  %417 = vmatprep.subr.bf16.mxu0 %v480_v6  ;;  %v418_v14 = vpack.c.bf16 %v195_v13, %v194_v12  ;;  %v275_v20 = vld [vmem:[#allocation2 + $0x40] sm:$0xff]  ;;  %v378_v26 = vld [vmem:[#allocation2 + $0x48] ss:$0 sm:$0xff]  ;;  %s449_s25 = scalar_lea.vmem %s363_s1, 128  ;;  %p454_p9 = scmp.lt.s32.totalorder %s363_s1, %s363_s1 }
  0x18   :  { %416 = vmatpush3.bf16.msra.mxu1 %v415_v5  ;;  %p450_p8 = scmp.ne.s32.totalorder %s363_s1, %s449_s25  ;;  %p455_p10 = scmp.lt.s32.totalorder %s449_s25, %s449_s25 }
  0x19   :  { %409 = vmatprep.subr.mxu1 %v478_v0  ;;  %419 = vmatpush3.bf16.msra.mxu0 %v418_v14 }
  0x1a   :  { %p456_p11 = por %p455_p10, %p454_p9 }
  0x1c   :  { %p457_p12 = pnand %p456_p11, %p450_p8 }
  0xe9   :  { %v107_v8 = vpop.f32.mrb[0].mxu0 }
  0xea   :  { %v108_v9 = vadd.f32 %v371_v7, %v107_v8  ;;  %v394_v10 = vpop.f32.mrb[1].mxu0 }
  0xec   :  { %v111_v11 = vmax.f32 %v108_v9, 0.0 }
  0xee   :  { %400 = vmatmul.mubr.msk.f32.vlgmr.msra.gmra.mrb[0].mxu1 %vm119_vm3, %v111_v11 }
  0xef   :  { %411 = vmatprep.mubr.msk.f32.mxu1 %vm479_vm0, %v478_v0  ;;  %410 = vmatpush3.msra.mxu1 %v275_v20 }
 0x1c1   :  { %v189_v16 = vpop.f32.mrb[0].mxu1 }
 0x1c2   :  { %v190_v17 = vadd.f32 %v374_v15, %v189_v16  ;;  %v401_v18 = vpop.f32.mrb[1].mxu1 }
 0x1c4   :  { %v193_v19 = vmax.f32 %v190_v17, 0.0 }
 0x1c6   :  { %407 = vmatmul.mubr.msk.f32.vlgmr.msra.gmra.mrb[2].mxu0 %vm119_vm3, %v193_v19 }
 0x299   :  { %v270_v22 = vpop.f32.mrb[2].mxu0 }
 0x29a   :  { %v271_v23 = vadd.f32 %v376_v21, %v270_v22  ;;  %v408_v24 = vpop.f32.mrb[3].mxu0 }
 0x29c   :  { %v274_v25 = vmax.f32 %v271_v23, 0.0 }
 0x29e   :  { %412 = vmatmul.mubr.msk.f32.vlgmr.msra.gmra.mrb[2].mxu1 %vm281_vm4, %v274_v25 }
 0x371   :  { %v351_v27 = vpop.f32.mrb[2].mxu1 }
 0x372   :  { %v352_v28 = vadd.f32 %v378_v26, %v351_v27  ;;  %v413_v29 = vpop.f32.mrb[3].mxu1 }
 0x374   :  { %355 = vst [vmem:[#allocation5] sm:$0xff] %v352_v28 }
 0x375   :  { %460 = shalt.err (!%p457_p12)
}
 0x376   :  { %s461_s28 = scalar_lea.hbm %s530_s2, 128 }
 0x377   :  { %p462_p13 = scmp.ne.s32.totalorder %s530_s2, %s461_s28  ;;  %p465_p0 = scmp.lt.u32.totalorder %s461_s28, %s530_s2 }
 0x379   :  { %p467_p1 = pnand %p465_p0, %p462_p13 }
 0x37b   :  { %470 = shalt.err (!%p467_p1)
}
 0x37c   :  { %365 = dma.vmem_to_hbm [thread:$0]  %s363_s1, 128, %s530_s2, [#allocation4]  }
 0x37d   :  { %473 = dma.done.wait [#allocation4], 128  }
 0x37e   :  { %474 = vsyncadd [#allocation4], 4294967168 }
 0x37f   :  { %369 = vsyncpa [#allocation3], 1 }
 0x380   :  { %370 = vsyncpa [#allocation4], 1 }

</bundles_post_ra>
